<compile_context>
chip_gen: v6e
topology: v6e:2x2x1
jax: 0.10.0
libtpu: 0.0.40
codegen_flags: <defaults>
</compile_context>

<pallas_src>
import jax
import jax.numpy as jnp
from jax.experimental import pallas as pl
from jax.experimental.pallas import tpu as pltpu

# Fixed Sobel weights (identical to the PyTorch module's __init__), used by the
# plain-JAX reference below.
_WX = ((-1.0, 0.0, 1.0),
       (-2.0, 0.0, 2.0),
       (-1.0, 0.0, 1.0))
_WY = ((-1.0, -2.0, -1.0),
       (0.0, 0.0, 0.0),
       (1.0, 2.0, 1.0))


# ----------------------------------------------------------------------------
# VMEM budget / batch-tile sizing
# ----------------------------------------------------------------------------

def _vmem_budget_bytes():
    """Per-generation scoped-VMEM budget with headroom for compiler scratch."""
    try:
        cap = int(pltpu.get_tpu_info().vmem_capacity_bytes)
    except Exception:
        cap = 64 << 20          # conservative: v7x per-TensorCore physical VMEM
    # ~75% of physical, never above 96 MiB (v5e/v6e), never below 32 MiB.
    return max(32 << 20, min((cap * 3) // 4, 96 << 20))


def _choose_batch_tile(n, per_item_in_bytes, per_item_f32_bytes,
                       vmem_budget_bytes, align):
    """Pick the per-grid-step batch tile.

    Targets ~2 MiB of input block per stream (measured elementwise kernels hit
    ~85-90% of HBM roofline there), shrinks until the true footprint
    (2 streams x 2 pipeline buffers + ~10 block-sized f32 intermediates) fits
    the VMEM budget, then caps the tile so the grid keeps >= 2 blocks when the
    batch is large enough (v7x megacore).
    """
    target_block = 2 << 20
    tb = max(align, (target_block // max(per_item_in_bytes, 1)) // align * align)

    def footprint(t):
        return 4 * t * per_item_in_bytes + 10 * t * per_item_f32_bytes

    while tb > align and footprint(tb) > vmem_budget_bytes:
        tb -= align
    # TODO(synk): a single image whose own footprint exceeds the VMEM budget
    # needs spatial tiling with a 2-row/2-col halo; not implemented here.

    n_align = pl.cdiv(n, align) * align
    if n_align >= 2 * align:
        tb = min(tb, max(align, ((n_align // 2) // align) * align))
    return int(min(tb, n_align))


# ----------------------------------------------------------------------------
# Flat (lane-dense) path: W < 128.  Each image = one row of L = H*W lanes.
# ----------------------------------------------------------------------------

def _make_flat_kernel(w, l_pad):
    # To read element [k + s] at lane k, roll by (l_pad - s) (jnp.roll
    # convention: result[k] = x[(k - shift) mod l_pad]).  All valid outputs
    # only read flat indices < H*W, so padding / wraparound never leaks in
    # (the invalid tail is zeroed by the mask).
    s_p1 = l_pad - 1
    s_p2 = l_pad - 2
    s_pw = l_pad - w
    s_p2w = l_pad - 2 * w

    def sobel(flat):
        # Separable Sobel on the flattened layout (3 column taps + 5 row taps).
        x1 = pltpu.roll(flat, shift=s_p1, axis=1)      # img[k + 1]
        x2 = pltpu.roll(flat, shift=s_p2, axis=1)      # img[k + 2]
        d = x2 - flat                                   # column taps [-1, 0, 1]
        s = flat + 2.0 * x1 + x2                        # column taps [ 1, 2, 1]
        d_r1 = pltpu.roll(d, shift=s_pw, axis=1)        # d[k + W]   (next row)
        d_r2 = pltpu.roll(d, shift=s_p2w, axis=1)       # d[k + 2W]
        s_r2 = pltpu.roll(s, shift=s_p2w, axis=1)       # s[k + 2W]
        gx = d + 2.0 * d_r1 + d_r2                      # row taps [ 1, 2, 1]
        gy = s_r2 - s                                   # row taps [-1, 0, 1]
        return jnp.abs(gx) + jnp.abs(gy)

    def kernel(x_ref, y_ref, mask_ref, out_ref):
        g1 = sobel(x_ref[...].astype(jnp.float32))      # (TB, L_pad)
        g2 = sobel(y_ref[...].astype(jnp.float32))
        diff = jnp.abs(g1 - g2) * mask_ref[...]         # zero out wrapped cols/rows
        # Reduce over the batch (sublane) axis only; writeback = L_pad floats.
        out_ref[...] = jnp.sum(diff, axis=0, keepdims=True)[:, None, :]

    return kernel


def _gradient_loss_flat(x, y, n, h, w, vmem_budget, batch_tile):
    l = h * w
    l_pad = pl.cdiv(l, 128) * 128
    in_item = x.dtype.itemsize
    per_img_in = l_pad * in_item
    per_img_f32 = l_pad * 4

    if batch_tile is not None:
        tb = max(8, pl.cdiv(int(batch_tile), 8) * 8)
    else:
        tb = _choose_batch_tile(n, per_img_in, per_img_f32, vmem_budget, align=8)
    n_pad = pl.cdiv(n, tb) * tb
    num_blocks = n_pad // tb

    x2 = x.reshape(n, l)
    y2 = y.reshape(n, l)
    if n_pad != n or l_pad != l:
        pad = ((0, n_pad - n), (0, l_pad - l))
        x2 = jnp.pad(x2, pad)          # zero images/lanes contribute 0 to the sum
        y2 = jnp.pad(y2, pad)

    # Valid-output mask for the flattened layout (avoids integer div/mod on the
    # VPU): flat index k = i*W + j is valid iff i <= H-3 and j <= W-3.
    k = jnp.arange(l_pad, dtype=jnp.int32)
    mask = (((k % w) < (w - 2)) & ((k // w) < (h - 2))).astype(jnp.float32)
    mask = mask.reshape(1, l_pad)

    cost = pl.CostEstimate(
        flops=int(40 * n * h * w),
        transcendentals=0,
        bytes_accessed=int(2 * n * h * w * in_item + num_blocks * l_pad * 4),
    )

    partials = pl.pallas_call(
        _make_flat_kernel(w, l_pad),
        out_shape=jax.ShapeDtypeStruct((num_blocks, 1, l_pad), jnp.float32),
        grid_spec=pltpu.PrefetchScalarGridSpec(
            num_scalar_prefetch=0,
            grid=(num_blocks,),
            in_specs=[
                pl.BlockSpec((tb, l_pad), lambda b: (b, 0)),
                pl.BlockSpec((tb, l_pad), lambda b: (b, 0)),
                pl.BlockSpec((1, l_pad), lambda b: (0, 0)),
            ],
            out_specs=pl.BlockSpec((1, 1, l_pad), lambda b: (b, 0, 0)),
        ),
        compiler_params=pltpu.CompilerParams(
            dimension_semantics=("parallel",),   # no resident accumulator
            vmem_limit_bytes=int(vmem_budget),
        ),
        cost_estimate=cost,
    )(x2, y2, mask)

    total = n * (h - 2) * (w - 2)
    return jnp.sum(partials) / jnp.float32(total)


# ----------------------------------------------------------------------------
# 3-D per-image path: W >= 128 (lane axis already reasonably dense).
# ----------------------------------------------------------------------------

def _sobel_mag_3d(img):
    """|corr(img, WX)| + |corr(img, WY)|, valid padding; img: (TB, H, W) f32."""
    h = img.shape[-2]
    w = img.shape[-1]
    c0 = img[:, :, 0:w - 2]
    c1 = img[:, :, 1:w - 1]
    c2 = img[:, :, 2:w]
    d = c2 - c0                       # column taps [-1, 0, 1]
    s = c0 + 2.0 * c1 + c2            # column taps [ 1, 2, 1]
    gx = d[:, 0:h - 2] + 2.0 * d[:, 1:h - 1] + d[:, 2:h]
    gy = s[:, 2:h] - s[:, 0:h - 2]
    return jnp.abs(gx) + jnp.abs(gy)


def _grad_loss_kernel_3d(x_ref, y_ref, out_ref):
    g1 = _sobel_mag_3d(x_ref[...].astype(jnp.float32))
    g2 = _sobel_mag_3d(y_ref[...].astype(jnp.float32))
    diff = jnp.abs(g1 - g2)                              # (TB, H-2, W-2)
    # Reduce over batch and H; writeback shrinks to (1, 1, W-2).
    out_ref[...] = jnp.sum(diff, axis=(0, 1), keepdims=True)


def _gradient_loss_3d(x, y, n, h, w, vmem_budget, batch_tile):
    lane = pl.cdiv(w, 128) * 128
    sub = pl.cdiv(h, 8) * 8
    in_item = x.dtype.itemsize
    per_img_in = lane * sub * in_item
    per_img_f32 = lane * sub * 4

    tb = (int(batch_tile) if batch_tile is not None else
          _choose_batch_tile(n, per_img_in, per_img_f32, vmem_budget, align=1))
    n_pad = pl.cdiv(n, tb) * tb
    num_blocks = n_pad // tb

    x3 = x.reshape(n, h, w)
    y3 = y.reshape(n, h, w)
    if n_pad != n:
        pad = ((0, n_pad - n), (0, 0), (0, 0))
        x3 = jnp.pad(x3, pad)
        y3 = jnp.pad(y3, pad)

    cost = pl.CostEstimate(
        flops=int(40 * n * h * w),
        transcendentals=0,
        bytes_accessed=int(2 * n * h * w * in_item + num_blocks * (w - 2) * 4),
    )

    partials = pl.pallas_call(
        _grad_loss_kernel_3d,
        out_shape=jax.ShapeDtypeStruct((num_blocks, 1, w - 2), jnp.float32),
        grid_spec=pltpu.PrefetchScalarGridSpec(
            num_scalar_prefetch=0,
            grid=(num_blocks,),
            in_specs=[
                pl.BlockSpec((tb, h, w), lambda b: (b, 0, 0)),
                pl.BlockSpec((tb, h, w), lambda b: (b, 0, 0)),
            ],
            out_specs=pl.BlockSpec((1, 1, w - 2), lambda b: (b, 0, 0)),
        ),
        compiler_params=pltpu.CompilerParams(
            dimension_semantics=("parallel",),
            vmem_limit_bytes=int(vmem_budget),
        ),
        cost_estimate=cost,
    )(x3, y3)

    total = n * (h - 2) * (w - 2)
    return jnp.sum(partials) / jnp.float32(total)


# ----------------------------------------------------------------------------
# Public entry point
# ----------------------------------------------------------------------------

def gradient_loss(x, y, *, batch_tile=None):
    """x, y: (N, 1, H, W) arrays (f32 or bf16). Returns scalar f32 loss."""
    assert x.shape == y.shape and x.shape[1] == 1
    n, _, h, w = x.shape
    assert h >= 3 and w >= 3
    vmem_budget = _vmem_budget_bytes()
    if w < 128:
        return _gradient_loss_flat(x, y, n, h, w, vmem_budget, batch_tile)
    return _gradient_loss_3d(x, y, n, h, w, vmem_budget, batch_tile)


# ----------------------------------------------------------------------------
# Plain-JAX reference + self-check
# ----------------------------------------------------------------------------

def _reference(x, y):
    def sobel(img):  # (N, H, W)
        n_, h_, w_ = img.shape
        ho, wo = h_ - 2, w_ - 2
        gx = jnp.zeros((n_, ho, wo), jnp.float32)
        gy = jnp.zeros((n_, ho, wo), jnp.float32)
        for i in range(3):
            for j in range(3):
                p = img[:, i:i + ho, j:j + wo].astype(jnp.float32)
                gx = gx + _WX[i][j] * p
                gy = gy + _WY[i][j] * p
        return jnp.abs(gx) + jnp.abs(gy)

    g1 = sobel(x[:, 0])
    g2 = sobel(y[:, 0])
    return jnp.mean(jnp.abs(g1 - g2))


if __name__ == "__main__":
    key = jax.random.PRNGKey(0)
    kx, ky = jax.random.split(key)
    N, C, H, W = 2, 1, 16, 16          # C must be 1 to match the (1,1,3,3) conv weights
    x = jax.random.normal(kx, (N, C, H, W), dtype=jnp.float32)
    y = jax.random.normal(ky, (N, C, H, W), dtype=jnp.float32)

    loss = jax.block_until_ready(gradient_loss(x, y))
    ref = jax.block_until_ready(_reference(x, y))
    assert jnp.allclose(loss, ref, rtol=1e-5, atol=1e-5), (loss, ref)

    print("KERNEL_OK")
</pallas_src>

<mosaic_0001>
module attributes {stable_mosaic.version = 11 : i64} {
  func.func @kernel(%arg0: i32, %arg1: memref<8x256xf32, #tpu.memory_space<vmem>>, %arg2: memref<8x256xf32, #tpu.memory_space<vmem>>, %arg3: memref<1x256xf32, #tpu.memory_space<vmem>>, %arg4: memref<1x1x256xf32, #tpu.memory_space<vmem>>) attributes {dimension_semantics = [#tpu.dimension_semantics<parallel>], iteration_bounds = array<i64: 1>, scalar_prefetch = 0 : i64, scratch_operands = 0 : i64, tpu.core_type = #tpu.core_type<tc>, window_params = [{transform_indices = @transform_0, window_bounds = array<i64: 8, 256>}, {transform_indices = @transform_1, window_bounds = array<i64: 8, 256>}, {pipeline_mode = #tpu.pipeline_mode<synchronous>, transform_indices = @transform_2, window_bounds = array<i64: 1, 256>}, {transform_indices = @transform_3, window_bounds = array<i64: 1, 1, 256>}]} {
    %c0 = arith.constant 0 : index
    %c0_0 = arith.constant 0 : index
    %0 = vector.load %arg1[%c0, %c0_0] : memref<8x256xf32, #tpu.memory_space<vmem>>, vector<8x256xf32>
    %c255_i32 = arith.constant 255 : i32
    %1 = tpu.dynamic_rotate %0 by %c255_i32 dim 1 : vector<8x256xf32>, i32 -> vector<8x256xf32>
    %c254_i32 = arith.constant 254 : i32
    %2 = tpu.dynamic_rotate %0 by %c254_i32 dim 1 : vector<8x256xf32>, i32 -> vector<8x256xf32>
    %3 = arith.subf %2, %0 : vector<8x256xf32>
    %cst = arith.constant 2.000000e+00 : f32
    %4 = vector.broadcast %cst : f32 to vector<8x256xf32>
    %5 = arith.mulf %4, %1 : vector<8x256xf32>
    %6 = arith.addf %0, %5 : vector<8x256xf32>
    %7 = arith.addf %6, %2 : vector<8x256xf32>
    %c240_i32 = arith.constant 240 : i32
    %8 = tpu.dynamic_rotate %3 by %c240_i32 dim 1 : vector<8x256xf32>, i32 -> vector<8x256xf32>
    %c224_i32 = arith.constant 224 : i32
    %9 = tpu.dynamic_rotate %3 by %c224_i32 dim 1 : vector<8x256xf32>, i32 -> vector<8x256xf32>
    %c224_i32_1 = arith.constant 224 : i32
    %10 = tpu.dynamic_rotate %7 by %c224_i32_1 dim 1 : vector<8x256xf32>, i32 -> vector<8x256xf32>
    %cst_2 = arith.constant 2.000000e+00 : f32
    %11 = vector.broadcast %cst_2 : f32 to vector<8x256xf32>
    %12 = arith.mulf %11, %8 : vector<8x256xf32>
    %13 = arith.addf %3, %12 : vector<8x256xf32>
    %14 = arith.addf %13, %9 : vector<8x256xf32>
    %15 = arith.subf %10, %7 : vector<8x256xf32>
    %16 = math.absf %14 : vector<8x256xf32>
    %17 = math.absf %15 : vector<8x256xf32>
    %18 = arith.addf %16, %17 : vector<8x256xf32>
    %c0_3 = arith.constant 0 : index
    %c0_4 = arith.constant 0 : index
    %19 = vector.load %arg2[%c0_3, %c0_4] : memref<8x256xf32, #tpu.memory_space<vmem>>, vector<8x256xf32>
    %c255_i32_5 = arith.constant 255 : i32
    %20 = tpu.dynamic_rotate %19 by %c255_i32_5 dim 1 : vector<8x256xf32>, i32 -> vector<8x256xf32>
    %c254_i32_6 = arith.constant 254 : i32
    %21 = tpu.dynamic_rotate %19 by %c254_i32_6 dim 1 : vector<8x256xf32>, i32 -> vector<8x256xf32>
    %22 = arith.subf %21, %19 : vector<8x256xf32>
    %cst_7 = arith.constant 2.000000e+00 : f32
    %23 = vector.broadcast %cst_7 : f32 to vector<8x256xf32>
    %24 = arith.mulf %23, %20 : vector<8x256xf32>
    %25 = arith.addf %19, %24 : vector<8x256xf32>
    %26 = arith.addf %25, %21 : vector<8x256xf32>
    %c240_i32_8 = arith.constant 240 : i32
    %27 = tpu.dynamic_rotate %22 by %c240_i32_8 dim 1 : vector<8x256xf32>, i32 -> vector<8x256xf32>
    %c224_i32_9 = arith.constant 224 : i32
    %28 = tpu.dynamic_rotate %22 by %c224_i32_9 dim 1 : vector<8x256xf32>, i32 -> vector<8x256xf32>
    %c224_i32_10 = arith.constant 224 : i32
    %29 = tpu.dynamic_rotate %26 by %c224_i32_10 dim 1 : vector<8x256xf32>, i32 -> vector<8x256xf32>
    %cst_11 = arith.constant 2.000000e+00 : f32
    %30 = vector.broadcast %cst_11 : f32 to vector<8x256xf32>
    %31 = arith.mulf %30, %27 : vector<8x256xf32>
    %32 = arith.addf %22, %31 : vector<8x256xf32>
    %33 = arith.addf %32, %28 : vector<8x256xf32>
    %34 = arith.subf %29, %26 : vector<8x256xf32>
    %35 = math.absf %33 : vector<8x256xf32>
    %36 = math.absf %34 : vector<8x256xf32>
    %37 = arith.addf %35, %36 : vector<8x256xf32>
    %38 = arith.subf %18, %37 : vector<8x256xf32>
    %39 = math.absf %38 : vector<8x256xf32>
    %c0_12 = arith.constant 0 : index
    %c0_13 = arith.constant 0 : index
    %40 = vector.load %arg3[%c0_12, %c0_13] : memref<1x256xf32, #tpu.memory_space<vmem>>, vector<1x256xf32>
    %41 = vector.broadcast %40 : vector<1x256xf32> to vector<8x256xf32>
    %42 = arith.mulf %39, %41 : vector<8x256xf32>
    %cst_14 = arith.constant dense<0.000000e+00> : vector<256xf32>
    %43 = vector.multi_reduction <add>, %42, %cst_14 [0] : vector<8x256xf32> to vector<256xf32>
    %44 = vector.shape_cast %43 : vector<256xf32> to vector<1x256xf32>
    %45 = vector.shape_cast %44 : vector<1x256xf32> to vector<1x1x256xf32>
    %c0_15 = arith.constant 0 : index
    %c0_16 = arith.constant 0 : index
    %c0_17 = arith.constant 0 : index
    %46 = vector.load %arg4[%c0_15, %c0_16, %c0_17] : memref<1x1x256xf32, #tpu.memory_space<vmem>>, vector<1x1x256xf32>
    tpu.vector_store %arg4[%c0_15, %c0_16, %c0_17], %45 {strides = array<i32>} : memref<1x1x256xf32, #tpu.memory_space<vmem>>, vector<1x1x256xf32>,
    return
  }
  func.func @transform_0(%arg0: i32) -> (i32, i32) {
    %c0_i32 = arith.constant 0 : i32
    %c0_i32_0 = arith.constant 0 : i32
    return %arg0, %c0_i32 : i32, i32
  }
  func.func @transform_1(%arg0: i32) -> (i32, i32) {
    %c0_i32 = arith.constant 0 : i32
    %c0_i32_0 = arith.constant 0 : i32
    return %arg0, %c0_i32 : i32, i32
  }
  func.func @transform_2(%arg0: i32) -> (i32, i32) {
    %c0_i32 = arith.constant 0 : i32
    %c0_i32_0 = arith.constant 0 : i32
    %c0_i32_1 = arith.constant 0 : i32
    return %c0_i32, %c0_i32_0 : i32, i32
  }
  func.func @transform_3(%arg0: i32) -> (i32, i32, i32) {
    %c0_i32 = arith.constant 0 : i32
    %c0_i32_0 = arith.constant 0 : i32
    %c0_i32_1 = arith.constant 0 : i32
    return %arg0, %c0_i32, %c0_i32_0 : i32, i32, i32
  }
}

</mosaic_0001>

<bundles_post_ra>
// kernel: tpu_custom_call.1
= control target key start
LH: loop header
LB: loop body
LE: loop exit
PB: predicated region body
PF: predicated region fallthrough
CT: control target
= control target key end

     0   :  { %8 = vsyncpa [#allocation3], 0  ;;  %s369_s0 = inlined_call_operand.hbm [shape: f32[8,256], index: 0, kind: input, shape index: {}]   ;;  %s370_s1 = inlined_call_operand.hbm [shape: f32[8,256], index: 1, kind: input, shape index: {}]   ;;  %s371_s2 = inlined_call_operand.vmem [shape: f32[1,256], index: 2, kind: input, shape index: {}]   ;;  %s372_s3 = inlined_call_operand.hbm [shape: f32[1,1,256], index: 3, kind: output, shape index: {}]  }
   0x1   :  { %9 = vsyncpa [#allocation6], 0 }
   0x2   :  { %10 = vsyncpa [#allocation4], 0  ;;  %s296_s12 = smov [#allocation2]   ;;  %s297_s14 = smov [#allocation5]  }
   0x3   :  { %s17_s13 = sshll.u32 %s296_s12, 4  ;;  %s27_s15 = sshll.u32 %s297_s14, 4  ;;  %s18_s13 = int_to_ptr.vmem [resolvable:$true] %s17_s13  ;;  %s28_s15 = int_to_ptr.vmem [resolvable:$true] %s27_s15 }
   0x4   :  { %s238_s16 = scalar_lea.vmem %s18_s13, 256  ;;  %p243_p1 = scmp.lt.s32.totalorder %s18_s13, %s18_s13 }
   0x5   :  { %p239_p0 = scmp.ne.s32.totalorder %s18_s13, %s238_s16  ;;  %p244_p2 = scmp.lt.s32.totalorder %s238_s16, %s238_s16 }
   0x7   :  { %p245_p3 = por %p244_p2, %p243_p1 }
   0x9   :  { %p246_p4 = pnand %p245_p3, %p239_p0 }
   0xb   :  { %249 = shalt.err (!%p246_p4)
}
   0xc   :  { %20 = dma.hbm_to_vmem [thread:$0]  %s369_s0, 256, %s18_s13, [#allocation3]  }
   0xd   :  { %s258_s19 = scalar_lea.vmem %s28_s15, 256  ;;  %p263_p6 = scmp.lt.s32.totalorder %s28_s15, %s28_s15 }
   0xe   :  { %p259_p5 = scmp.ne.s32.totalorder %s28_s15, %s258_s19  ;;  %p264_p7 = scmp.lt.s32.totalorder %s258_s19, %s258_s19 }
  0x10   :  { %p265_p8 = por %p264_p7, %p263_p6 }
  0x12   :  { %p266_p9 = pnand %p265_p8, %p259_p5 }
  0x14   :  { %269 = shalt.err (!%p266_p9)
}
  0x15   :  { %30 = dma.hbm_to_vmem [thread:$0]  %s370_s1, 256, %s28_s15, [#allocation6]  }
  0x16   :  { %290 = dma.done.wait [#allocation3], 256  }
  0x17   :  { %291 = vsyncadd [#allocation3], 4294967040 }
  0x18   :  { %292 = dma.done.wait [#allocation6], 256  }
  0x19   :  { %293 = vsyncadd [#allocation6], 4294967040  ;;  %v39_v0 = vld [vmem:[#allocation2] sm:$0xff]  ;;  %s298_s22 = smov 126   ;;  %s299_s23 = smov 127   ;;  %v40_v1 = vld [vmem:[#allocation2 + $0x8] sm:$0xff]  ;;  %v45_v4 = vlaneseq }
  0x1a   :  { %50 = vrot.lane.b32.xlu1 %v39_v0, %s298_s22  ;;  %41 = vrot.lane.b32.xlu0 %v39_v0, %s299_s23  ;;  %v100_v2 = vld [vmem:[#allocation5 + $0x8] sm:$0xff]  ;;  %v99_v3 = vld [vmem:[#allocation5] sm:$0xff]  ;;  %s300_s0 = smov 112   ;;  %s301_s1 = smov 96  }
  0x1b   :  { %v331_v5 = vand.u32 127, %v45_v4  ;;  %v160_v55 = vshrl.u32 %v45_v4, 7  ;;  %vm203_vm4 = vcmp.lt.s32.totalorder %v45_v4, 256 }
  0x1d   :  { %vm54_vm0 = vcmp.lt.s32.totalorder %v331_v5, 126  ;;  %vm47_vm1 = vcmp.lt.s32.totalorder %v331_v5, 127  ;;  %vm69_vm2 = vcmp.lt.s32.totalorder %v331_v5, 112  ;;  %vm76_vm3 = vcmp.lt.s32.totalorder %v331_v5, 96 }
  0x1e   :  { %52 = vrot.lane.b32.xlu1 %v40_v1, %s298_s22  ;;  %43 = vrot.lane.b32.xlu0 %v40_v1, %s299_s23 }
  0x22   :  { %103 = vrot.lane.b32.xlu1 %v100_v2, %s299_s23  ;;  %101 = vrot.lane.b32.xlu0 %v99_v3, %s299_s23 }
  0x26   :  { %109 = vrot.lane.b32.xlu1 %v100_v2, %s298_s22  ;;  %107 = vrot.lane.b32.xlu0 %v99_v3, %s298_s22 }
  0x8c   :  { %v51_v6 = vpop.permute.xlu1 %50  ;;  %v42_v7 = vpop.permute.xlu0 %41 }
  0x90   :  { %v53_v8 = vpop.permute.xlu1 %52  ;;  %v44_v9 = vpop.permute.xlu0 %43 }
  0x91   :  { %v55_v10 = vsel %vm54_vm0, %v51_v6, %v53_v8  ;;  %v56_v11 = vsel %vm54_vm0, %v53_v8, %v51_v6  ;;  %v48_v22 = vsel %vm47_vm1, %v42_v7, %v44_v9  ;;  %v49_v23 = vsel %vm47_vm1, %v44_v9, %v42_v7 }
  0x92   :  { %v57_v12 = vsub.f32 %v55_v10, %v39_v0  ;;  %v58_v13 = vsub.f32 %v56_v11, %v40_v1  ;;  %v59_v24 = vmul.f32 2.0, %v48_v22  ;;  %v60_v25 = vmul.f32 2.0, %v49_v23 }
  0x94   :  { %67 = vrot.lane.b32.xlu1 %v58_v13, %s300_s0  ;;  %v104_v14 = vpop.permute.xlu1 %103  ;;  %65 = vrot.lane.b32.xlu0 %v57_v12, %s300_s0  ;;  %v102_v15 = vpop.permute.xlu0 %101  ;;  %v61_v28 = vadd.f32 %v59_v24, %v39_v0  ;;  %v62_v29 = vadd.f32 %v60_v25, %v40_v1 }
  0x95   :  { %v105_v26 = vsel %vm47_vm1, %v102_v15, %v104_v14  ;;  %v106_v27 = vsel %vm47_vm1, %v104_v14, %v102_v15  ;;  %v165_v14 = vsub.s32 1, %v160_v55 }
  0x96   :  { %v115_v30 = vmul.f32 2.0, %v105_v26  ;;  %v116_v31 = vmul.f32 2.0, %v106_v27  ;;  %v64_v34 = vadd.f32 %v62_v29, %v56_v11  ;;  %v63_v35 = vadd.f32 %v61_v28, %v55_v10  ;;  %v157_v27 = vld [vmem:[%s371_s2] sm:$0x3]  ;;  %s303_s2 = smov [#allocation7]  }
  0x97   :  { %s212_s26 = sshll.u32 %s303_s2, 4  ;;  %s213_s26 = int_to_ptr.vmem [resolvable:$true] %s212_s26 }
  0x98   :  { %v110_v16 = vpop.permute.xlu1 %109  ;;  %v108_v17 = vpop.permute.xlu0 %107  ;;  %v117_v32 = vadd.f32 %v115_v30, %v99_v3  ;;  %v118_v33 = vadd.f32 %v116_v31, %v100_v2  ;;  %s270_s27 = scalar_lea.vmem %s213_s26, 32  ;;  %p275_p11 = scmp.lt.s32.totalorder %s213_s26, %s213_s26 }
  0x99   :  { %v111_v18 = vsel %vm54_vm0, %v108_v17, %v110_v16  ;;  %v112_v19 = vsel %vm54_vm0, %v110_v16, %v108_v17  ;;  %p271_p10 = scmp.ne.s32.totalorder %s213_s26, %s270_s27  ;;  %p276_p12 = scmp.lt.s32.totalorder %s270_s27, %s270_s27 }
  0x9a   :  { %v113_v20 = vsub.f32 %v111_v18, %v99_v3  ;;  %v114_v21 = vsub.f32 %v112_v19, %v100_v2  ;;  %v119_v36 = vadd.f32 %v117_v32, %v111_v18  ;;  %v120_v37 = vadd.f32 %v118_v33, %v112_v19 }
  0x9b   :  { %v166_v32 = vrot.slane %v157_v27, %v165_v14  ;;  %p277_p13 = por %p276_p12, %p275_p11 }
  0x9c   :  { %123 = vrot.lane.b32.xlu1 %v114_v21, %s300_s0  ;;  %121 = vrot.lane.b32.xlu0 %v113_v20, %s300_s0 }
  0x9d   :  { %p278_p0 = pnand %p277_p13, %p271_p10 }
  0xa0   :  { %74 = vrot.lane.b32.xlu1 %v58_v13, %s301_s1  ;;  %72 = vrot.lane.b32.xlu0 %v57_v12, %s301_s1 }
  0xa4   :  { %129 = vrot.lane.b32.xlu1 %v114_v21, %s301_s1  ;;  %127 = vrot.lane.b32.xlu0 %v113_v20, %s301_s1 }
  0xa8   :  { %81 = vrot.lane.b32.xlu1 %v64_v34, %s301_s1  ;;  %79 = vrot.lane.b32.xlu0 %v63_v35, %s301_s1 }
  0xac   :  { %135 = vrot.lane.b32.xlu1 %v120_v37, %s301_s1  ;;  %133 = vrot.lane.b32.xlu0 %v119_v36, %s301_s1 }
 0x106   :  { %v68_v38 = vpop.permute.xlu1 %67  ;;  %v66_v39 = vpop.permute.xlu0 %65 }
 0x107   :  { %v70_v42 = vsel %vm69_vm2, %v66_v39, %v68_v38  ;;  %v71_v45 = vsel %vm69_vm2, %v68_v38, %v66_v39 }
 0x108   :  { %v85_v47 = vmul.f32 2.0, %v70_v42  ;;  %v86_v49 = vmul.f32 2.0, %v71_v45 }
 0x10a   :  { %v87_v54 = vadd.f32 %v85_v47, %v57_v12  ;;  %v88_v56 = vadd.f32 %v86_v49, %v58_v13  ;;  %v161_v13 = vsub.s32 0, %v160_v55 }
 0x10c   :  { %v162_v5 = vrot.slane %v157_v27, %v161_v13 }
 0x10e   :  { %v124_v40 = vpop.permute.xlu1 %123  ;;  %v122_v41 = vpop.permute.xlu0 %121 }
 0x10f   :  { %v125_v46 = vsel %vm69_vm2, %v122_v41, %v124_v40  ;;  %v126_v48 = vsel %vm69_vm2, %v124_v40, %v122_v41 }
 0x110   :  { %v139_v52 = vmul.f32 2.0, %v125_v46  ;;  %v140_v53 = vmul.f32 2.0, %v126_v48 }
 0x112   :  { %v75_v43 = vpop.permute.xlu1 %74  ;;  %v73_v44 = vpop.permute.xlu0 %72  ;;  %v141_v62 = vadd.f32 %v139_v52, %v113_v20  ;;  %v142_v2 = vadd.f32 %v140_v53, %v114_v21 }
 0x113   :  { %v77_v57 = vsel %vm76_vm3, %v73_v44, %v75_v43  ;;  %v78_v58 = vsel %vm76_vm3, %v75_v43, %v73_v44  ;;  %v302_v43 = vmov 1966171168  }
 0x114   :  { %v89_v7 = vadd.f32 %v87_v54, %v77_v57  ;;  %v90_v8 = vadd.f32 %v88_v56, %v78_v58  ;;  %v187_v44 = vunpack.c.l.s4 %v302_v43 }
 0x116   :  { %v130_v50 = vpop.permute.xlu1 %129  ;;  %v128_v51 = vpop.permute.xlu0 %127  ;;  %v93_v21 = vand.u32 2147483647, %v89_v7  ;;  %v94_v22 = vand.u32 2147483647, %v90_v8  ;;  %v188_v49 = vunpack.c.0.s8 %v187_v44 }
 0x117   :  { %v131_v59 = vsel %vm76_vm3, %v128_v51, %v130_v50  ;;  %v132_v63 = vsel %vm76_vm3, %v130_v50, %v128_v51 }
 0x118   :  { %v143_v9 = vadd.f32 %v141_v62, %v131_v59  ;;  %v144_v10 = vadd.f32 %v142_v2, %v132_v63  ;;  %v191_v54 = vsub.s32 %v188_v49, %v160_v55 }
 0x11a   :  { %v82_v60 = vpop.permute.xlu1 %81  ;;  %v80_v61 = vpop.permute.xlu0 %79  ;;  %v147_v23 = vand.u32 2147483647, %v143_v9  ;;  %v148_v24 = vand.u32 2147483647, %v144_v10 }
 0x11b   :  { %v83_v0 = vsel %vm76_vm3, %v80_v61, %v82_v60  ;;  %v84_v1 = vsel %vm76_vm3, %v82_v60, %v80_v61 }
 0x11c   :  { %v91_v3 = vsub.f32 %v83_v0, %v63_v35  ;;  %v92_v6 = vsub.f32 %v84_v1, %v64_v34 }
 0x11e   :  { %v136_v11 = vpop.permute.xlu1 %135  ;;  %v134_v12 = vpop.permute.xlu0 %133  ;;  %v95_v17 = vand.u32 2147483647, %v91_v3  ;;  %v96_v18 = vand.u32 2147483647, %v92_v6 }
 0x11f   :  { %v137_v15 = vsel %vm76_vm3, %v134_v12, %v136_v11  ;;  %v138_v16 = vsel %vm76_vm3, %v136_v11, %v134_v12 }
 0x120   :  { %v145_v19 = vsub.f32 %v137_v15, %v119_v36  ;;  %v146_v20 = vsub.f32 %v138_v16, %v120_v37  ;;  %v97_v28 = vadd.f32 %v95_v17, %v93_v21  ;;  %v98_v29 = vadd.f32 %v96_v18, %v94_v22 }
 0x122   :  { %v149_v25 = vand.u32 2147483647, %v145_v19  ;;  %v150_v26 = vand.u32 2147483647, %v146_v20 }
 0x124   :  { %v151_v30 = vadd.f32 %v149_v25, %v147_v23  ;;  %v152_v31 = vadd.f32 %v150_v26, %v148_v24 }
 0x126   :  { %v153_v33 = vsub.f32 %v97_v28, %v151_v30  ;;  %v154_v34 = vsub.f32 %v98_v29, %v152_v31 }
 0x128   :  { %v155_v35 = vand.u32 2147483647, %v153_v33  ;;  %v156_v36 = vand.u32 2147483647, %v154_v34 }
 0x12a   :  { %v169_v37 = vmul.f32 %v162_v5, %v155_v35  ;;  %v170_v38 = vmul.f32 %v166_v32, %v156_v36 }
 0x12c   :  { %v171_v39 = vrot.slane %v169_v37, 4  ;;  %v177_v40 = vrot.slane %v170_v38, 4 }
 0x12e   :  { %v172_v41 = vadd.f32 %v171_v39, %v169_v37  ;;  %v178_v42 = vadd.f32 %v177_v40, %v170_v38 }
 0x130   :  { %v173_v45 = vrot.slane %v172_v41, 2  ;;  %v179_v46 = vrot.slane %v178_v42, 2 }
 0x132   :  { %v174_v47 = vadd.f32 %v173_v45, %v172_v41  ;;  %v180_v48 = vadd.f32 %v179_v46, %v178_v42 }
 0x134   :  { %v175_v50 = vrot.slane %v174_v47, 1  ;;  %v181_v51 = vrot.slane %v180_v48, 1 }
 0x136   :  { %v176_v52 = vadd.f32 %v175_v50, %v174_v47  ;;  %v182_v53 = vadd.f32 %v181_v51, %v180_v48 }
 0x138   :  { %v185_v56 = vcombine.low %v176_v52, %v182_v53 }
 0x13a   :  { %v192_v57 = vrot.slane %v185_v56, %v191_v54 }
 0x13c   :  { %v199_v58 = vrot.slane %v192_v57, %v191_v54 }
 0x13e   :  { %205 = vst.msk [vmem:[#allocation7] sm:$0x3] %vm203_vm4, %v199_v58 }
 0x13f   :  { %281 = shalt.err (!%p278_p0)
}
 0x140   :  { %215 = dma.vmem_to_hbm [thread:$0]  %s213_s26, 32, %s372_s3, [#allocation4]  }
 0x141   :  { %294 = dma.done.wait [#allocation4], 32  }
 0x142   :  { %295 = vsyncadd [#allocation4], 4294967264 }
 0x143   :  { %219 = vsyncpa [#allocation3], 1 }
 0x144   :  { %220 = vsyncpa [#allocation6], 1 }
 0x145   :  { %221 = vsyncpa [#allocation4], 1 }

</bundles_post_ra>
